<compile_context>
chip_gen: v7x
topology: tpu7x:2x2x1
jax: 0.10.0
libtpu: 0.0.40
codegen_flags: <defaults>
</compile_context>

<pallas_src>
import functools

import numpy as np
import jax
import jax.numpy as jnp
from jax.experimental import pallas as pl
from jax.experimental.pallas import tpu as pltpu


_LANE = 128
_SUBLANE = 8
_BLOCK_ROWS = 2048       # (2048, 128) f32 = 1 MiB block for the two-pass path
_FUSED_MAX_ROWS = 2048   # <= 1 MiB resident -> single fused kernel


def _round_up(a, b):
    return -(-a // b) * b


def _c32(v):
    """32-bit hash constant as a Python int in int32 two's-complement range."""
    v &= 0xFFFFFFFF
    return v - 0x100000000 if v >= 0x80000000 else v


_GOLD = _c32(0x9E3779B9)
_MIX1 = _c32(0x85EBCA6B)
_MIX2 = _c32(0xC2B2AE35)
_TWO_PI = float(2.0 * np.pi)


# --------------------------------------------------------------------------
# Portable in-kernel PRNG (VPU/EUP ops only; works on Mosaic and interpret).
# --------------------------------------------------------------------------

def _lsr(x, k):
    """Logical right shift for int32 (arithmetic shift + mask of kept bits)."""
    return (x >> k) & ((1 << (32 - k)) - 1)


def _fmix32(x):
    """murmur3 finalizer: strong 32-bit mixer, plain integer VPU ops."""
    x = x ^ _lsr(x, 16)
    x = x * _MIX1
    x = x ^ _lsr(x, 13)
    x = x * _MIX2
    x = x ^ _lsr(x, 16)
    return x


def _bits_to_uniform(h):
    """Top 23 bits of an int32 hash -> uniform float32 in (0, 1)."""
    b = _lsr(h, 9)
    return (b.astype(jnp.float32) + 0.5) * (1.0 / float(1 << 23))


def _cos_2pi(u):
    """cos(2*pi*u), u in [0,1): quarter-period folding + Taylor polynomial.

    Avoids jnp.cos (sin/cos lowering is not universally available); max abs
    error ~1e-6, irrelevant for augmentation noise.
    """
    v = u - 0.5                       # cos(2pi u) = -cos(2pi v)
    w = jnp.abs(v)                    # [0, 0.5]
    flip = w > 0.25                   # cos(2pi w) = -cos(2pi (0.5 - w)) there
    s = jnp.where(flip, 0.5 - w, w)   # [0, 0.25] -> theta in [0, pi/2]
    t = _TWO_PI * s
    t2 = t * t
    c = 1.0 + t2 * (-0.5 + t2 * (1.0 / 24.0
                                 + t2 * (-1.0 / 720.0 + t2 * (1.0 / 40320.0))))
    c = jnp.where(flip, -c, c)        # == cos(2pi v)
    return -c


def _gauss_noise(idx, seed):
    """~N(0,1) noise as a pure function of (global flat index, seed)."""
    h1 = _fmix32(idx * _GOLD + seed)
    h2 = _fmix32(h1 + _GOLD)
    u1 = _bits_to_uniform(h1)
    u2 = _bits_to_uniform(h2)
    r = jnp.sqrt(-2.0 * jnp.log(u1))
    return r * _cos_2pi(u2)


# --------------------------------------------------------------------------
# Kernels
# --------------------------------------------------------------------------

def _fused_kernel(seed_ref, sigma_ref, x_ref, o_ref, *, total, eps, masked):
    """Whole tensor in one VMEM block: noise + min/max + normalize fused."""
    rows, lanes = x_ref.shape
    row = jax.lax.broadcasted_iota(jnp.int32, (rows, lanes), 0)
    col = jax.lax.broadcasted_iota(jnp.int32, (rows, lanes), 1)
    idx = row * lanes + col

    y = x_ref[...] + sigma_ref[0] * _gauss_noise(idx, seed_ref[0])

    if masked:
        ok = idx < total
        mn = jnp.min(jnp.where(ok, y, jnp.inf))
        mx = jnp.max(jnp.where(ok, y, -jnp.inf))
    else:
        mn = jnp.min(y)
        mx = jnp.max(y)

    o_ref[...] = (y - mn) * (1.0 / (mx - mn + eps))


def _noise_minmax_kernel(seed_ref, sigma_ref, x_ref, y_ref, pmin_ref, pmax_ref,
                         *, total, ragged):
    """Pass 1: y = x + sigma*N(0,1); per-block (8,128) partial min/max."""
    i = pl.program_id(0)
    br, lanes = x_ref.shape
    row = jax.lax.broadcasted_iota(jnp.int32, (br, lanes), 0)
    col = jax.lax.broadcasted_iota(jnp.int32, (br, lanes), 1)
    idx = (i * br + row) * lanes + col

    y = x_ref[...] + sigma_ref[0] * _gauss_noise(idx, seed_ref[0])
    y_ref[...] = y

    def write_partials(lo, hi):
        # Fold rows in groups of 8 (sublane-preserving reshape, VPU-only min).
        pmin_ref[0] = jnp.min(lo.reshape(br // _SUBLANE, _SUBLANE, lanes), axis=0)
        pmax_ref[0] = jnp.max(hi.reshape(br // _SUBLANE, _SUBLANE, lanes), axis=0)

    if ragged:
        last = pl.num_programs(0) - 1

        @pl.when(i == last)          # masked reduce only on the last block
        def _():
            ok = idx < total
            write_partials(jnp.where(ok, y, jnp.inf), jnp.where(ok, y, -jnp.inf))

        @pl.when(i != last)
        def _():
            write_partials(y, y)
    else:
        write_partials(y, y)


def _normalize_kernel(mn_ref, mx_ref, y_ref, o_ref, *, eps):
    """Pass 2: out = (y - min) / (max - min + eps)."""
    mn = mn_ref[0]
    inv = 1.0 / (mx_ref[0] - mn + eps)
    o_ref[...] = (y_ref[...] - mn) * inv


# --------------------------------------------------------------------------
# Wrappers
# --------------------------------------------------------------------------

_SMEM = pl.BlockSpec(memory_space=pltpu.MemorySpace.SMEM)


@functools.partial(jax.jit, static_argnames=("eps",))
def _random_noise_fused(x, seed, sigma, *, eps):
    orig_shape = x.shape
    xf = x.astype(jnp.float32).reshape(-1)
    total = xf.shape[0]
    rows8 = _round_up(pl.cdiv(total, _LANE), _SUBLANE)
    t_pad = rows8 * _LANE
    masked = t_pad != total
    if masked:
        xf = jnp.pad(xf, (0, t_pad - total))
    x2d = xf.reshape(rows8, _LANE)

    out2d = pl.pallas_call(
        functools.partial(_fused_kernel, total=total, eps=eps, masked=masked),
        out_shape=jax.ShapeDtypeStruct((rows8, _LANE), jnp.float32),
        in_specs=[_SMEM, _SMEM, pl.BlockSpec(memory_space=pltpu.MemorySpace.VMEM)],
        out_specs=pl.BlockSpec(memory_space=pltpu.MemorySpace.VMEM),
    )(seed, sigma, x2d)

    out = out2d.reshape(-1)
    if masked:
        out = out[:total]
    return out.reshape(orig_shape)


@functools.partial(jax.jit, static_argnames=("eps", "block_rows"))
def _random_noise_two_pass(x, seed, sigma, *, eps, block_rows):
    orig_shape = x.shape
    xf = x.astype(jnp.float32).reshape(-1)
    total = xf.shape[0]
    rows8 = _round_up(pl.cdiv(total, _LANE), _SUBLANE)
    t_pad = rows8 * _LANE
    if t_pad != total:
        xf = jnp.pad(xf, (0, t_pad - total))
    x2d = xf.reshape(rows8, _LANE)

    br = min(int(block_rows), rows8)
    nblk = pl.cdiv(rows8, br)
    ragged = (t_pad != total) or (rows8 % br != 0)

    blk = pl.BlockSpec((br, _LANE), lambda i: (i, 0))
    part = pl.BlockSpec((1, _SUBLANE, _LANE), lambda i: (i, 0, 0))

    # Pass 1: noise + per-block partial min/max (no cross-block accumulator,
    # so the grid axis can be "parallel" -> both TensorCores on v7x).
    y2d, pmin, pmax = pl.pallas_call(
        functools.partial(_noise_minmax_kernel, total=total, ragged=ragged),
        out_shape=(
            jax.ShapeDtypeStruct((rows8, _LANE), jnp.float32),
            jax.ShapeDtypeStruct((nblk, _SUBLANE, _LANE), jnp.float32),
            jax.ShapeDtypeStruct((nblk, _SUBLANE, _LANE), jnp.float32),
        ),
        grid=(nblk,),
        in_specs=[_SMEM, _SMEM, blk],
        out_specs=(blk, part, part),
        compiler_params=pltpu.CompilerParams(
            dimension_semantics=("parallel",)),
    )(seed, sigma, x2d)

    # Tiny final reduce on the partial tiles (pure XLA, negligible).
    mn = jnp.min(pmin).reshape((1,))
    mx = jnp.max(pmax).reshape((1,))

    # Pass 2: normalize; output aliases the noisy buffer.
    out2d = pl.pallas_call(
        functools.partial(_normalize_kernel, eps=eps),
        out_shape=jax.ShapeDtypeStruct((rows8, _LANE), jnp.float32),
        grid=(nblk,),
        in_specs=[_SMEM, _SMEM, blk],
        out_specs=blk,
        input_output_aliases={2: 0},
        compiler_params=pltpu.CompilerParams(
            dimension_semantics=("parallel",)),
    )(mn, mx, y2d)

    out = out2d.reshape(-1)
    if t_pad != total:
        out = out[:total]
    return out.reshape(orig_shape)


def random_noise_2d(x, *, seed, sigma, eps=1e-7,
                    block_rows=_BLOCK_ROWS, fused_max_rows=_FUSED_MAX_ROWS):
    """y = normalize(x + sigma * N(0,1)) with Pallas TPU kernels."""
    x = jnp.asarray(x)
    seed_arr = jnp.asarray([int(seed)], dtype=jnp.int32)
    sigma_arr = jnp.asarray([float(sigma)], dtype=jnp.float32)
    total = int(np.prod(x.shape))
    rows8 = _round_up(pl.cdiv(total, _LANE), _SUBLANE)
    if rows8 <= fused_max_rows:
        return _random_noise_fused(x, seed_arr, sigma_arr, eps=float(eps))
    return _random_noise_two_pass(x, seed_arr, sigma_arr,
                                  eps=float(eps), block_rows=int(block_rows))


class RandomNoise2D:
    """JAX/Pallas port of the PyTorch RandomNoise2D transform."""

    def __init__(self, p=0.5, seed=None):
        self.p = p
        self.epsilon = 1e-07
        # Host-side RNG for the gate / sigma / kernel seed, mirroring the
        # torch.rand / np.random draws in the reference (no device sync).
        self._rng = np.random.default_rng(seed)

    def __call__(self, sample):
        input_data = sample['input']
        if self._rng.random() >= self.p:        # torch.rand(1) < p
            return sample
        sigma = 0.1 + 0.1 * self._rng.random()  # 0.1 + 0.1*np.random.rand(1)
        seed = int(self._rng.integers(0, 2**31 - 1))
        sample.update({'input': random_noise_2d(input_data, seed=seed,
                                                sigma=sigma, eps=self.epsilon)})
        return sample

    def __repr__(self):
        return f'{self.__class__.__name__}(p={self.p})'


if __name__ == "__main__":
    key = jax.random.PRNGKey(0)
    k1, k2 = jax.random.split(key)

    N, C, H, W = 2, 4, 16, 16
    x = jax.random.normal(k1, (N, C, H, W), dtype=jnp.float32)

    # p=1.0 -> noise branch always fires (fused kernel path).
    module = RandomNoise2D(p=1.0, seed=0)
    out = module({'input': x})
    y = out['input']
    jax.block_until_ready(y)

    assert y.shape == x.shape and y.dtype == jnp.float32
    y_min = float(jnp.min(y))
    y_max = float(jnp.max(y))
    assert abs(y_min - 0.0) < 1e-5, y_min        # shifted to start at 0
    assert abs(y_max - 1.0) < 1e-3, y_max        # scaled to ~1
    assert not bool(jnp.allclose(y, x))          # noise actually applied

    # Output stays highly correlated with the input (sigma <= 0.2).
    xf = x.reshape(-1)
    yf = y.reshape(-1)
    xc = xf - jnp.mean(xf)
    yc = yf - jnp.mean(yf)
    corr = float(jnp.sum(xc * yc) /
                 (jnp.sqrt(jnp.sum(xc * xc)) * jnp.sqrt(jnp.sum(yc * yc))))
    assert corr > 0.9, corr

    # p=0.0 -> identity: kernels skipped, sample returned unchanged.
    ident = RandomNoise2D(p=0.0, seed=0)({'input': x})
    assert ident['input'] is x

    # Non-128-multiple element count exercises the masked (padded) reduction.
    x2 = jax.random.normal(k2, (2, 3, 10, 7), dtype=jnp.float32)
    out2 = RandomNoise2D(p=1.0, seed=1)({'input': x2})
    y2 = out2['input']
    jax.block_until_ready(y2)
    assert y2.shape == x2.shape
    assert abs(float(jnp.min(y2))) < 1e-5
    assert abs(float(jnp.max(y2)) - 1.0) < 1e-3

    # Force the two-pass (large-tensor) path with small blocks to exercise
    # the blocked partial-min/max reduction + aliased normalize pass.
    y3 = random_noise_2d(x, seed=123, sigma=0.15, eps=1e-7,
                         block_rows=8, fused_max_rows=0)
    jax.block_until_ready(y3)
    assert y3.shape == x.shape
    assert abs(float(jnp.min(y3))) < 1e-5
    assert abs(float(jnp.max(y3)) - 1.0) < 1e-3

    print("KERNEL_OK")
</pallas_src>

<mosaic_0001>
module attributes {stable_mosaic.version = 11 : i64} {
  func.func @_fused_kernel(%arg0: memref<1xi32, #tpu.memory_space<smem>>, %arg1: memref<1xf32, #tpu.memory_space<smem>>, %arg2: memref<16x128xf32, #tpu.memory_space<vmem>>, %arg3: memref<16x128xf32, #tpu.memory_space<vmem>>) attributes {dimension_semantics = [], scalar_prefetch = 0 : i64, scratch_operands = 0 : i64, tpu.core_type = #tpu.core_type<tc>} {
    %0 = tpu.iota {dimensions = array<i32: 0>} : vector<16x128xi32>
    %1 = tpu.iota {dimensions = array<i32: 1>} : vector<16x128xi32>
    %c128_i32 = arith.constant 128 : i32
    %2 = vector.broadcast %c128_i32 : i32 to vector<16x128xi32>
    %3 = arith.muli %0, %2 : vector<16x128xi32>
    %4 = arith.addi %3, %1 : vector<16x128xi32>
    %c0 = arith.constant 0 : index
    %c0_0 = arith.constant 0 : index
    %5 = vector.load %arg2[%c0, %c0_0] : memref<16x128xf32, #tpu.memory_space<vmem>>, vector<16x128xf32>
    %c0_1 = arith.constant 0 : index
    %6 = memref.load %arg1[%c0_1] : memref<1xf32, #tpu.memory_space<smem>>
    %c0_2 = arith.constant 0 : index
    %7 = memref.load %arg0[%c0_2] : memref<1xi32, #tpu.memory_space<smem>>
    %c-1640531527_i32 = arith.constant -1640531527 : i32
    %8 = vector.broadcast %c-1640531527_i32 : i32 to vector<16x128xi32>
    %9 = arith.muli %4, %8 : vector<16x128xi32>
    %10 = vector.broadcast %7 : i32 to vector<16x128xi32>
    %11 = arith.addi %9, %10 : vector<16x128xi32>
    %c16_i32 = arith.constant 16 : i32
    %12 = vector.broadcast %c16_i32 : i32 to vector<16x128xi32>
    %13 = arith.shrsi %11, %12 : vector<16x128xi32>
    %c65535_i32 = arith.constant 65535 : i32
    %14 = vector.broadcast %c65535_i32 : i32 to vector<16x128xi32>
    %15 = arith.andi %13, %14 : vector<16x128xi32>
    %16 = arith.xori %11, %15 : vector<16x128xi32>
    %c-2048144789_i32 = arith.constant -2048144789 : i32
    %17 = vector.broadcast %c-2048144789_i32 : i32 to vector<16x128xi32>
    %18 = arith.muli %16, %17 : vector<16x128xi32>
    %c13_i32 = arith.constant 13 : i32
    %19 = vector.broadcast %c13_i32 : i32 to vector<16x128xi32>
    %20 = arith.shrsi %18, %19 : vector<16x128xi32>
    %c524287_i32 = arith.constant 524287 : i32
    %21 = vector.broadcast %c524287_i32 : i32 to vector<16x128xi32>
    %22 = arith.andi %20, %21 : vector<16x128xi32>
    %23 = arith.xori %18, %22 : vector<16x128xi32>
    %c-1028477387_i32 = arith.constant -1028477387 : i32
    %24 = vector.broadcast %c-1028477387_i32 : i32 to vector<16x128xi32>
    %25 = arith.muli %23, %24 : vector<16x128xi32>
    %c16_i32_3 = arith.constant 16 : i32
    %26 = vector.broadcast %c16_i32_3 : i32 to vector<16x128xi32>
    %27 = arith.shrsi %25, %26 : vector<16x128xi32>
    %c65535_i32_4 = arith.constant 65535 : i32
    %28 = vector.broadcast %c65535_i32_4 : i32 to vector<16x128xi32>
    %29 = arith.andi %27, %28 : vector<16x128xi32>
    %30 = arith.xori %25, %29 : vector<16x128xi32>
    %c-1640531527_i32_5 = arith.constant -1640531527 : i32
    %31 = vector.broadcast %c-1640531527_i32_5 : i32 to vector<16x128xi32>
    %32 = arith.addi %30, %31 : vector<16x128xi32>
    %c16_i32_6 = arith.constant 16 : i32
    %33 = vector.broadcast %c16_i32_6 : i32 to vector<16x128xi32>
    %34 = arith.shrsi %32, %33 : vector<16x128xi32>
    %c65535_i32_7 = arith.constant 65535 : i32
    %35 = vector.broadcast %c65535_i32_7 : i32 to vector<16x128xi32>
    %36 = arith.andi %34, %35 : vector<16x128xi32>
    %37 = arith.xori %32, %36 : vector<16x128xi32>
    %c-2048144789_i32_8 = arith.constant -2048144789 : i32
    %38 = vector.broadcast %c-2048144789_i32_8 : i32 to vector<16x128xi32>
    %39 = arith.muli %37, %38 : vector<16x128xi32>
    %c13_i32_9 = arith.constant 13 : i32
    %40 = vector.broadcast %c13_i32_9 : i32 to vector<16x128xi32>
    %41 = arith.shrsi %39, %40 : vector<16x128xi32>
    %c524287_i32_10 = arith.constant 524287 : i32
    %42 = vector.broadcast %c524287_i32_10 : i32 to vector<16x128xi32>
    %43 = arith.andi %41, %42 : vector<16x128xi32>
    %44 = arith.xori %39, %43 : vector<16x128xi32>
    %c-1028477387_i32_11 = arith.constant -1028477387 : i32
    %45 = vector.broadcast %c-1028477387_i32_11 : i32 to vector<16x128xi32>
    %46 = arith.muli %44, %45 : vector<16x128xi32>
    %c16_i32_12 = arith.constant 16 : i32
    %47 = vector.broadcast %c16_i32_12 : i32 to vector<16x128xi32>
    %48 = arith.shrsi %46, %47 : vector<16x128xi32>
    %c65535_i32_13 = arith.constant 65535 : i32
    %49 = vector.broadcast %c65535_i32_13 : i32 to vector<16x128xi32>
    %50 = arith.andi %48, %49 : vector<16x128xi32>
    %51 = arith.xori %46, %50 : vector<16x128xi32>
    %c9_i32 = arith.constant 9 : i32
    %52 = vector.broadcast %c9_i32 : i32 to vector<16x128xi32>
    %53 = arith.shrsi %30, %52 : vector<16x128xi32>
    %c8388607_i32 = arith.constant 8388607 : i32
    %54 = vector.broadcast %c8388607_i32 : i32 to vector<16x128xi32>
    %55 = arith.andi %53, %54 : vector<16x128xi32>
    %56 = arith.sitofp %55 : vector<16x128xi32> to vector<16x128xf32>
    %cst = arith.constant 5.000000e-01 : f32
    %57 = vector.broadcast %cst : f32 to vector<16x128xf32>
    %58 = arith.addf %56, %57 : vector<16x128xf32>
    %cst_14 = arith.constant 1.1920929E-7 : f32
    %59 = vector.broadcast %cst_14 : f32 to vector<16x128xf32>
    %60 = arith.mulf %58, %59 : vector<16x128xf32>
    %c9_i32_15 = arith.constant 9 : i32
    %61 = vector.broadcast %c9_i32_15 : i32 to vector<16x128xi32>
    %62 = arith.shrsi %51, %61 : vector<16x128xi32>
    %c8388607_i32_16 = arith.constant 8388607 : i32
    %63 = vector.broadcast %c8388607_i32_16 : i32 to vector<16x128xi32>
    %64 = arith.andi %62, %63 : vector<16x128xi32>
    %65 = arith.sitofp %64 : vector<16x128xi32> to vector<16x128xf32>
    %cst_17 = arith.constant 5.000000e-01 : f32
    %66 = vector.broadcast %cst_17 : f32 to vector<16x128xf32>
    %67 = arith.addf %65, %66 : vector<16x128xf32>
    %cst_18 = arith.constant 1.1920929E-7 : f32
    %68 = vector.broadcast %cst_18 : f32 to vector<16x128xf32>
    %69 = arith.mulf %67, %68 : vector<16x128xf32>
    %70 = math.log %60 : vector<16x128xf32>
    %cst_19 = arith.constant -2.000000e+00 : f32
    %71 = vector.broadcast %cst_19 : f32 to vector<16x128xf32>
    %72 = arith.mulf %71, %70 : vector<16x128xf32>
    %73 = math.sqrt %72 : vector<16x128xf32>
    %cst_20 = arith.constant 5.000000e-01 : f32
    %74 = vector.broadcast %cst_20 : f32 to vector<16x128xf32>
    %75 = arith.subf %69, %74 : vector<16x128xf32>
    %76 = math.absf %75 : vector<16x128xf32>
    %cst_21 = arith.constant 2.500000e-01 : f32
    %77 = vector.broadcast %cst_21 : f32 to vector<16x128xf32>
    %78 = arith.cmpf ogt, %76, %77 : vector<16x128xf32>
    %cst_22 = arith.constant 5.000000e-01 : f32
    %79 = vector.broadcast %cst_22 : f32 to vector<16x128xf32>
    %80 = arith.subf %79, %76 : vector<16x128xf32>
    %81 = arith.select %78, %80, %76 : vector<16x128xi1>, vector<16x128xf32>
    %cst_23 = arith.constant 6.28318548 : f32
    %82 = vector.broadcast %cst_23 : f32 to vector<16x128xf32>
    %83 = arith.mulf %82, %81 : vector<16x128xf32>
    %84 = arith.mulf %83, %83 : vector<16x128xf32>
    %cst_24 = arith.constant 2.48015876E-5 : f32
    %85 = vector.broadcast %cst_24 : f32 to vector<16x128xf32>
    %86 = arith.mulf %84, %85 : vector<16x128xf32>
    %cst_25 = arith.constant -0.00138888892 : f32
    %87 = vector.broadcast %cst_25 : f32 to vector<16x128xf32>
    %88 = arith.addf %87, %86 : vector<16x128xf32>
    %89 = arith.mulf %84, %88 : vector<16x128xf32>
    %cst_26 = arith.constant 0.0416666679 : f32
    %90 = vector.broadcast %cst_26 : f32 to vector<16x128xf32>
    %91 = arith.addf %90, %89 : vector<16x128xf32>
    %92 = arith.mulf %84, %91 : vector<16x128xf32>
    %cst_27 = arith.constant -5.000000e-01 : f32
    %93 = vector.broadcast %cst_27 : f32 to vector<16x128xf32>
    %94 = arith.addf %93, %92 : vector<16x128xf32>
    %95 = arith.mulf %84, %94 : vector<16x128xf32>
    %cst_28 = arith.constant 1.000000e+00 : f32
    %96 = vector.broadcast %cst_28 : f32 to vector<16x128xf32>
    %97 = arith.addf %96, %95 : vector<16x128xf32>
    %cst_29 = arith.constant 0.000000e+00 : f32
    %98 = vector.broadcast %cst_29 : f32 to vector<16x128xf32>
    %99 = arith.subf %98, %97 : vector<16x128xf32>
    %100 = arith.select %78, %99, %97 : vector<16x128xi1>, vector<16x128xf32>
    %cst_30 = arith.constant 0.000000e+00 : f32
    %101 = vector.broadcast %cst_30 : f32 to vector<16x128xf32>
    %102 = arith.subf %101, %100 : vector<16x128xf32>
    %103 = arith.mulf %73, %102 : vector<16x128xf32>
    %104 = vector.broadcast %6 : f32 to vector<16x128xf32>
    %105 = arith.mulf %104, %103 : vector<16x128xf32>
    %106 = arith.addf %5, %105 : vector<16x128xf32>
    %107 = vector.shape_cast %106 : vector<16x128xf32> to vector<1x16x128xf32>
    %cst_31 = arith.constant dense<0x7F800000> : vector<1xf32>
    %108 = vector.multi_reduction <minimumf>, %107, %cst_31 [1, 2] : vector<1x16x128xf32> to vector<1xf32>
    %109 = vector.shape_cast %108 : vector<1xf32> to vector<1x1x1xf32>
    %110 = vector.extract %109[0, 0, 0] : f32 from vector<1x1x1xf32>
    %111 = vector.shape_cast %106 : vector<16x128xf32> to vector<1x16x128xf32>
    %cst_32 = arith.constant dense<0xFF800000> : vector<1xf32>
    %112 = vector.multi_reduction <maximumf>, %111, %cst_32 [1, 2] : vector<1x16x128xf32> to vector<1xf32>
    %113 = vector.shape_cast %112 : vector<1xf32> to vector<1x1x1xf32>
    %114 = vector.extract %113[0, 0, 0] : f32 from vector<1x1x1xf32>
    %115 = vector.broadcast %110 : f32 to vector<16x128xf32>
    %116 = arith.subf %106, %115 : vector<16x128xf32>
    %117 = arith.subf %114, %110 : f32
    %cst_33 = arith.constant 1.000000e-07 : f32
    %118 = arith.addf %117, %cst_33 : f32
    %cst_34 = arith.constant 1.000000e+00 : f32
    %119 = arith.divf %cst_34, %118 : f32
    %120 = vector.broadcast %119 : f32 to vector<16x128xf32>
    %121 = arith.mulf %116, %120 : vector<16x128xf32>
    %c0_35 = arith.constant 0 : index
    %c0_36 = arith.constant 0 : index
    %122 = vector.load %arg3[%c0_35, %c0_36] : memref<16x128xf32, #tpu.memory_space<vmem>>, vector<16x128xf32>
    tpu.vector_store %arg3[%c0_35, %c0_36], %121 {strides = array<i32>} : memref<16x128xf32, #tpu.memory_space<vmem>>, vector<16x128xf32>,
    return
  }
}

</mosaic_0001>

<bundles_post_ra>
// kernel: _random_noise_fused.1
= control target key start
LH: loop header
LB: loop body
LE: loop exit
PB: predicated region body
PF: predicated region fallthrough
CT: control target
= control target key end

     0   :  { %v16_v0 = vlaneseq  ;;  %s276_s0 = inlined_call_operand.<no memory space> [shape: s32[1], index: 0, kind: input, shape index: {}]   ;;  %s277_s1 = inlined_call_operand.<no memory space> [shape: f32[1], index: 1, kind: input, shape index: {}]   ;;  %s278_s2 = inlined_call_operand.vmem [shape: f32[16,128], index: 2, kind: input, shape index: {}]   ;;  %s279_s3 = inlined_call_operand.vmem [shape: f32[16,128], index: 3, kind: output, shape index: {}]  }
   0x1   :  { %v31_v7 = vstv %s276_s0 }
   0x2   :  { %v17_v1 = vshrl.u32 %v16_v0, 7  ;;  %v20_v2 = vand.u32 127, %v16_v0 }
   0x4   :  { %v18_v3 = vadd.s32 8, %v17_v1  ;;  %v21_v4 = vmul.u32 128, %v17_v1 }
   0x6   :  { %v22_v5 = vmul.u32 128, %v18_v3  ;;  %v23_v6 = vadd.s32 %v21_v4, %v20_v2 }
   0x8   :  { %v24_v8 = vadd.s32 %v22_v5, %v20_v2  ;;  %v29_v9 = vmul.u32 2654435769, %v23_v6 }
   0xa   :  { %v30_v10 = vmul.u32 2654435769, %v24_v8  ;;  %v32_v11 = vadd.s32 %v31_v7, %v29_v9 }
   0xc   :  { %v33_v12 = vadd.s32 %v31_v7, %v30_v10  ;;  %v200_v13 = vshrl.u32 %v32_v11, 16 }
   0xe   :  { %v201_v14 = vshrl.u32 %v33_v12, 16  ;;  %v38_v15 = vxor.u32 %v200_v13, %v32_v11 }
  0x10   :  { %v39_v16 = vxor.u32 %v201_v14, %v33_v12  ;;  %v40_v17 = vmul.u32 2246822507, %v38_v15 }
  0x12   :  { %v41_v18 = vmul.u32 2246822507, %v39_v16  ;;  %v202_v19 = vshrl.u32 %v40_v17, 13 }
  0x14   :  { %v203_v20 = vshrl.u32 %v41_v18, 13  ;;  %v46_v21 = vxor.u32 %v202_v19, %v40_v17 }
  0x16   :  { %v47_v22 = vxor.u32 %v203_v20, %v41_v18  ;;  %v48_v23 = vmul.u32 3266489909, %v46_v21 }
  0x18   :  { %v49_v24 = vmul.u32 3266489909, %v47_v22  ;;  %v204_v25 = vshrl.u32 %v48_v23, 16 }
  0x1a   :  { %v205_v26 = vshrl.u32 %v49_v24, 16  ;;  %v54_v27 = vxor.u32 %v204_v25, %v48_v23 }
  0x1c   :  { %v55_v28 = vxor.u32 %v205_v26, %v49_v24  ;;  %v56_v29 = vadd.s32 2654435769, %v54_v27  ;;  %v212_v30 = vshrl.u32 %v54_v27, 9 }
  0x1e   :  { %v57_v31 = vadd.s32 2654435769, %v55_v28  ;;  %v206_v32 = vshrl.u32 %v56_v29, 16  ;;  %v213_v33 = vshrl.u32 %v55_v28, 9  ;;  %v84_v34 = vcvt.s32.f32 %v212_v30 }
  0x20   :  { %v207_v35 = vshrl.u32 %v57_v31, 16  ;;  %v62_v36 = vxor.u32 %v206_v32, %v56_v29  ;;  %v85_v37 = vcvt.s32.f32 %v213_v33  ;;  %v86_v40 = vadd.f32 0.5, %v84_v34 }
  0x22   :  { %v63_v38 = vxor.u32 %v207_v35, %v57_v31  ;;  %v64_v39 = vmul.u32 2246822507, %v62_v36  ;;  %v87_v43 = vadd.f32 0.5, %v85_v37  ;;  %v88_v46 = vmul.f32 1.1920929e-07, %v86_v40 }
  0x24   :  { %v65_v41 = vmul.u32 2246822507, %v63_v38  ;;  %v208_v42 = vshrl.u32 %v64_v39, 13  ;;  %v89_v49 = vmul.f32 1.1920929e-07, %v87_v43  ;;  %224 = vlog2.f32 %v88_v46 }
  0x26   :  { %v209_v44 = vshrl.u32 %v65_v41, 13  ;;  %v70_v45 = vxor.u32 %v208_v42, %v64_v39  ;;  %226 = vlog2.f32 %v89_v49 }
  0x28   :  { %v71_v47 = vxor.u32 %v209_v44, %v65_v41  ;;  %v72_v48 = vmul.u32 3266489909, %v70_v45 }
  0x2a   :  { %v73_v50 = vmul.u32 3266489909, %v71_v47  ;;  %v210_v51 = vshrl.u32 %v72_v48, 16 }
  0x2c   :  { %v211_v52 = vshrl.u32 %v73_v50, 16  ;;  %v78_v53 = vxor.u32 %v210_v51, %v72_v48  ;;  %v158_v48 = vstv %s277_s1  ;;  %v25_v51 = vld [vmem:[%s278_s2] sm:$0xff] }
  0x2e   :  { %v79_v54 = vxor.u32 %v211_v52, %v73_v50  ;;  %v214_v55 = vshrl.u32 %v78_v53, 9  ;;  %v225_v60 = vpop.eup %224 }
  0x2f   :  { %v101_v2 = vmul.f32 0.6931472, %v225_v60 }
  0x30   :  { %v215_v56 = vshrl.u32 %v79_v54, 9  ;;  %v94_v57 = vcvt.s32.f32 %v214_v55  ;;  %v227_v63 = vpop.eup %226  ;;  %v26_v54 = vld [vmem:[%s278_s2 + $0x8] sm:$0xff] }
  0x31   :  { %v103_v5 = vmul.f32 0.6931472, %v227_v63  ;;  %v104_v8 = vmul.f32 -2.0, %v101_v2 }
  0x32   :  { %v95_v58 = vcvt.s32.f32 %v215_v56  ;;  %v96_v59 = vadd.f32 0.5, %v94_v57 }
  0x33   :  { %v105_v11 = vmul.f32 -2.0, %v103_v5  ;;  %228 = vrsqrt.f32 %v104_v8  ;;  %vm108_vm2 = vcmp.eq.f32.partialorder %v104_v8, inf  ;;  %v111_v34 = vand.u32 2147483648, %v104_v8 }
  0x34   :  { %v97_v61 = vadd.f32 0.5, %v95_v58  ;;  %v98_v62 = vmul.f32 1.1920929e-07, %v96_v59  ;;  %vm110_vm4 = vcmp.eq.f32.partialorder %v104_v8, 0.0 }
  0x35   :  { %230 = vrsqrt.f32 %v105_v11  ;;  %vm115_vm3 = vcmp.eq.f32.partialorder %v105_v11, inf  ;;  %v118_v38 = vand.u32 2147483648, %v105_v11  ;;  %vm117_vm5 = vcmp.eq.f32.partialorder %v105_v11, 0.0 }
  0x36   :  { %v99_v0 = vmul.f32 1.1920929e-07, %v97_v61  ;;  %v216_v1 = vadd.f32 -0.5, %v98_v62 }
  0x38   :  { %v217_v3 = vadd.f32 -0.5, %v99_v0  ;;  %v122_v4 = vand.u32 2147483647, %v216_v1 }
  0x3a   :  { %v123_v6 = vand.u32 2147483647, %v217_v3  ;;  %vm124_vm0 = vcmp.gt.f32.partialorder %v122_v4, 0.25  ;;  %v126_v7 = vsub.f32 0.5, %v122_v4 }
  0x3c   :  { %vm125_vm1 = vcmp.gt.f32.partialorder %v123_v6, 0.25  ;;  %v127_v9 = vsub.f32 0.5, %v123_v6  ;;  %v128_v10 = vsel %vm124_vm0, %v126_v7, %v122_v4 }
  0x3d   :  { %v130_v12 = vmul.f32 6.2831855, %v128_v10  ;;  %v229_v24 = vpop.eup %228 }
  0x3e   :  { %v129_v13 = vsel %vm125_vm1, %v127_v9, %v123_v6  ;;  %v107_v30 = vmul.f32 %v229_v24, %v104_v8 }
  0x3f   :  { %v131_v14 = vmul.f32 6.2831855, %v129_v13  ;;  %v132_v15 = vmul.f32 %v130_v12, %v130_v12  ;;  %v231_v27 = vpop.eup %230 }
  0x40   :  { %v114_v33 = vmul.f32 %v231_v27, %v105_v11  ;;  %v109_v37 = vsel %vm108_vm2, %v104_v8, %v107_v30 }
  0x41   :  { %v133_v16 = vmul.f32 %v131_v14, %v131_v14  ;;  %v134_v17 = vmul.f32 2.4801588e-05, %v132_v15  ;;  %v112_v42 = vsel %vm110_vm4, %v111_v34, %v109_v37 }
  0x42   :  { %v116_v41 = vsel %vm115_vm3, %v105_v11, %v114_v33 }
  0x43   :  { %v135_v18 = vmul.f32 2.4801588e-05, %v133_v16  ;;  %v136_v19 = vadd.f32 -0.0013888889, %v134_v17  ;;  %v119_v46 = vsel %vm117_vm5, %v118_v38, %v116_v41 }
  0x45   :  { %v137_v20 = vadd.f32 -0.0013888889, %v135_v18  ;;  %v138_v21 = vmul.f32 %v136_v19, %v132_v15 }
  0x47   :  { %v139_v22 = vmul.f32 %v137_v20, %v133_v16  ;;  %v140_v23 = vadd.f32 0.041666668, %v138_v21 }
  0x49   :  { %v141_v25 = vadd.f32 0.041666668, %v139_v22  ;;  %v142_v26 = vmul.f32 %v140_v23, %v132_v15 }
  0x4b   :  { %v143_v28 = vmul.f32 %v141_v25, %v133_v16  ;;  %v144_v29 = vadd.f32 -0.5, %v142_v26 }
  0x4d   :  { %v145_v31 = vadd.f32 -0.5, %v143_v28  ;;  %v146_v32 = vmul.f32 %v144_v29, %v132_v15 }
  0x4f   :  { %v147_v35 = vmul.f32 %v145_v31, %v133_v16  ;;  %v148_v36 = vadd.f32 1.0, %v146_v32 }
  0x51   :  { %v149_v39 = vadd.f32 1.0, %v147_v35  ;;  %v150_v40 = vsub.f32 0.0, %v148_v36 }
  0x53   :  { %v151_v43 = vsub.f32 0.0, %v149_v39  ;;  %v152_v44 = vsel %vm124_vm0, %v150_v40, %v148_v36 }
  0x54   :  { %v154_v45 = vsub.f32 0.0, %v152_v44 }
  0x55   :  { %v153_v47 = vsel %vm125_vm1, %v151_v43, %v149_v39 }
  0x56   :  { %v155_v49 = vsub.f32 0.0, %v153_v47  ;;  %v156_v50 = vmul.f32 %v154_v45, %v112_v42 }
  0x58   :  { %v157_v52 = vmul.f32 %v155_v49, %v119_v46  ;;  %v159_v53 = vmul.f32 %v158_v48, %v156_v50 }
  0x5a   :  { %v160_v55 = vmul.f32 %v158_v48, %v157_v52  ;;  %v161_v56 = vadd.f32 %v159_v53, %v25_v51 }
  0x5c   :  { %v162_v57 = vadd.f32 %v160_v55, %v26_v54 }
  0x5e   :  { %v163_v58 = vmin.f32 %v161_v56, %v162_v57  ;;  %v173_v59 = vmax.f32 %v161_v56, %v162_v57 }
  0x60   :  { %164 = vmin.xlane.f32.xlu0 %v163_v58 }
  0x64   :  { %174 = vmax.xlane.f32.xlu0 %v173_v59 }
  0xed   :  { %v165_v60 = vpop.xlane.xlu0 %164 }
  0xee   :  { %v166_v61 = vrot.slane %v165_v60, 4 }
  0xf0   :  { %v167_v62 = vmin.f32 %v165_v60, %v166_v61 }
  0xf1   :  { %v175_v63 = vpop.xlane.xlu0 %174 }
  0xf2   :  { %v168_v0 = vrot.slane %v167_v62, 2  ;;  %v176_v1 = vrot.slane %v175_v63, 4 }
  0xf4   :  { %v177_v2 = vmax.f32 %v175_v63, %v176_v1  ;;  %v169_v3 = vmin.f32 %v167_v62, %v168_v0 }
  0xf6   :  { %v178_v4 = vrot.slane %v177_v2, 2  ;;  %v170_v5 = vrot.slane %v169_v3, 1 }
  0xf8   :  { %v179_v6 = vmax.f32 %v177_v2, %v178_v4  ;;  %v171_v7 = vmin.f32 %v169_v3, %v170_v5 }
  0xfa   :  { %218 = vpush %v171_v7  ;;  %v180_v8 = vrot.slane %v179_v6, 1 }
  0xfc   :  { %v181_v9 = vmax.f32 %v179_v6, %v180_v8 }
  0xfe   :  { %220 = vpush %v181_v9 }
 0x12b   :  { %s219_s1 = spop %218 }
 0x12c   :  { %v183_v12 = vstv %s219_s1 }
 0x12d   :  { %v184_v13 = vsub.f32 %v161_v56, %v183_v12  ;;  %v185_v14 = vsub.f32 %v162_v57, %v183_v12 }
 0x12f   :  { %s221_s2 = spop %220 }
 0x130   :  { %s186_s19 = ssub.f32 %s221_s2, %s219_s1 }
 0x132   :  { %s187_s20 = sadd.f32 1e-07, %s186_s19 }
 0x134   :  { %v188_v10 = vstv %s187_s20 }
 0x135   :  { %232 = vrcp.f32 %v188_v10 }
 0x13f   :  { %v233_v11 = vpop.eup %232 }
 0x140   :  { %222 = vpush %v233_v11 }
 0x171   :  { %s223_s21 = spop %222 }
 0x172   :  { %v191_v15 = vstv %s223_s21 }
 0x173   :  { %v192_v16 = vmul.f32 %v191_v15, %v184_v13  ;;  %v193_v17 = vmul.f32 %v191_v15, %v185_v14 }
 0x175   :  { %194 = vst [vmem:[%s279_s3] sm:$0xff] %v192_v16  ;;  %195 = vst [vmem:[%s279_s3 + $0x8] sm:$0xff] %v193_v17 }

</bundles_post_ra>
